<compile_context>
chip_gen: v7x
topology: tpu7x:2x2x1
jax: 0.10.0
libtpu: 0.0.40
codegen_flags: <defaults>
</compile_context>

<pallas_src>
import math
import functools

import jax
import jax.numpy as jnp
from jax import lax
from jax.experimental import pallas as pl
from jax.experimental.pallas import tpu as pltpu


def mha_kernel(q_in, k_in, v_in, w_qkv, b_qkv, wo, bo, out_ref,
               kcache_ref, vcache_ref, ctx_ref, *, h, d_k, kv_chunk):
    """One grid step == (one batch element, one query tile)."""
    f32 = jnp.float32
    bf16 = jnp.bfloat16
    scale = 1.0 / math.sqrt(d_k)
    S = kcache_ref.shape[0]
    tq = ctx_ref.shape[0]

    # ---- K/V projection: ONCE per batch element (qi == 0), cached in bf16 VMEM.
    # Valid across all query tiles because the qi axis is "arbitrary" (sequential).
    @pl.when(pl.program_id(1) == 0)
    def _():
        k = jnp.dot(k_in[0], w_qkv[1], preferred_element_type=f32) + b_qkv[1]
        v = jnp.dot(v_in[0], w_qkv[2], preferred_element_type=f32) + b_qkv[2]
        kcache_ref[...] = k.astype(bf16)
        vcache_ref[...] = v.astype(bf16)

    # ---- Q projection for this query tile; fold 1/sqrt(d_k) into Q once, cast bf16.
    q = jnp.dot(q_in[0], w_qkv[0], preferred_element_type=f32) + b_qkv[0]
    q = (q * scale).astype(bf16)                                 # [tq, d_model]

    n_chunks = (S + kv_chunk - 1) // kv_chunk

    # ---- Per-head attention, chunked over the cached K/V with online softmax so
    # the score intermediate is [tq, kv_chunk] (not [tq, S]).
    # NOTE: with d_k < 128 the head slices are sub-lane-width accesses and the MXU
    # K/N dims are underfilled; prefer d_k a multiple of 128 for peak efficiency.
    for hi in range(h):
        sl = slice(hi * d_k, (hi + 1) * d_k)
        qh = q[:, sl]                                            # [tq, d_k] bf16

        m = jnp.full((tq, 1), -jnp.inf, dtype=f32)
        l = jnp.zeros((tq, 1), dtype=f32)
        acc = jnp.zeros((tq, d_k), dtype=f32)
        for c in range(n_chunks):
            lo = c * kv_chunk
            cs = min(kv_chunk, S - lo)
            kh = kcache_ref[lo:lo + cs, sl]                      # [cs, d_k] bf16
            vh = vcache_ref[lo:lo + cs, sl]                      # [cs, d_k] bf16
            # scores = qh @ kh^T without materializing a transpose.
            s = lax.dot_general(qh, kh, (((1,), (1,)), ((), ())),
                                preferred_element_type=f32)      # [tq, cs]
            m_new = jnp.maximum(m, jnp.max(s, axis=-1, keepdims=True))
            alpha = jnp.exp(m - m_new)
            p = jnp.exp(s - m_new)
            l = alpha * l + jnp.sum(p, axis=-1, keepdims=True)
            acc = alpha * acc + jnp.dot(p.astype(bf16), vh,
                                        preferred_element_type=f32)
            m = m_new

        inv_l = pl.reciprocal(l, approx=True)   # EUP slot; exactness not required here
        ctx_ref[:, sl] = (acc * inv_l).astype(bf16)

    # ---- Single output projection with K = d_model.
    out = jnp.dot(ctx_ref[...], wo[...], preferred_element_type=f32) + bo[...]
    out_ref[0] = out.astype(out_ref.dtype)


def prepare_mha_params(params):
    """Stack / cast the projection weights ONCE (outside the per-call wrapper) so
    every forward launches straight into the kernel with no HBM re-materialization."""
    wq, bq, wk, bk, wv, bv, wo, bo = params
    w_qkv = jnp.stack([wq, wk, wv]).astype(jnp.bfloat16)   # [3, d_model, d_model]
    b_qkv = jnp.stack([bq, bk, bv]).astype(jnp.float32)    # [3, 1, d_model]
    return w_qkv, b_qkv, wo.astype(jnp.bfloat16), bo.astype(jnp.float32)


def _vmem_budget_bytes():
    """Per-generation VMEM budget: ~48 MiB on v7x (64 MiB physical), ~96-100 MiB on
    v5e/v6e (128 MiB physical). Leaves headroom for compiler-internal scratch."""
    try:
        cap = pltpu.get_tpu_info().vmem_capacity_bytes
    except Exception:
        cap = 64 * 1024 * 1024  # conservative fallback (v7x-sized)
    return int(min(cap * 3 // 4, 100 * 1024 * 1024))


def multihead_attention(query, key, value, prepared_params, h, *,
                        max_q_tile=None, kv_chunk=512, out_dtype=jnp.float32):
    """query/key/value: [B, S, d_model] float32. Returns [B, S, d_model] out_dtype.

    Pass out_dtype=jnp.bfloat16 to halve output writeback if the consumer tolerates it.
    """
    B, S, d_model = query.shape
    assert d_model % h == 0
    d_k = d_model // h
    w_qkv, b_qkv, wo_bf, bo_f32 = prepared_params

    vmem_limit = _vmem_budget_bytes()
    if max_q_tile is None:
        # 512 (multiple of 256) fills the 256-row MXU on v6e and amortizes grid
        # overhead when VMEM allows; tighter 256 tile on v7x's smaller VMEM.
        # (v5e's MXU is 128-deep, so any 128-multiple is already sufficient.)
        max_q_tile = 512 if vmem_limit >= 96 * 1024 * 1024 else 256

    tq = S if S <= max_q_tile else max_q_tile
    n_q = pl.cdiv(S, tq)
    kv_chunk = max(1, min(kv_chunk, S))

    # Cast activation inputs (per-call data) to bf16 once; weights are pre-cast.
    q_bf = query.astype(jnp.bfloat16)
    k_bf = key.astype(jnp.bfloat16)
    v_bf = value.astype(jnp.bfloat16)

    kernel = functools.partial(mha_kernel, h=h, d_k=d_k, kv_chunk=kv_chunk)

    q_spec = pl.BlockSpec((1, tq, d_model), lambda b, qi: (b, qi, 0))
    # K/V raw inputs: block index depends only on b -> not re-fetched across qi.
    kv_spec = pl.BlockSpec((1, S, d_model), lambda b, qi: (b, 0, 0))
    out_spec = pl.BlockSpec((1, tq, d_model), lambda b, qi: (b, qi, 0))
    # Grid-invariant weights/biases: single-buffered (double-buffering them only
    # wastes VMEM since their block never changes).
    w_qkv_spec = pl.BlockSpec((3, d_model, d_model), lambda b, qi: (0, 0, 0),
                              pipeline_mode=pl.Buffered(buffer_count=1))
    b_qkv_spec = pl.BlockSpec((3, 1, d_model), lambda b, qi: (0, 0, 0),
                              pipeline_mode=pl.Buffered(buffer_count=1))
    wo_spec = pl.BlockSpec((d_model, d_model), lambda b, qi: (0, 0),
                           pipeline_mode=pl.Buffered(buffer_count=1))
    bo_spec = pl.BlockSpec((1, d_model), lambda b, qi: (0, 0),
                           pipeline_mode=pl.Buffered(buffer_count=1))

    return pl.pallas_call(
        kernel,
        out_shape=jax.ShapeDtypeStruct((B, S, d_model), out_dtype),
        grid_spec=pltpu.PrefetchScalarGridSpec(
            num_scalar_prefetch=0,
            grid=(B, n_q),
            in_specs=[q_spec, kv_spec, kv_spec,
                      w_qkv_spec, b_qkv_spec, wo_spec, bo_spec],
            out_specs=out_spec,
            scratch_shapes=[
                pltpu.VMEM((S, d_model), jnp.bfloat16),   # cached projected K
                pltpu.VMEM((S, d_model), jnp.bfloat16),   # cached projected V
                pltpu.VMEM((tq, d_model), jnp.bfloat16),  # per-tile context
            ],
        ),
        compiler_params=pltpu.CompilerParams(
            # batch: parallel (megacore); query tiles: arbitrary (sequential) so the
            # per-batch K/V cache computed at qi == 0 stays valid across qi.
            dimension_semantics=("parallel", "arbitrary"),
            vmem_limit_bytes=vmem_limit,
        ),
    )(q_bf, k_bf, v_bf, w_qkv, b_qkv, wo_bf, bo_f32)


def reference_mha(query, key, value, params, h):
    """Pure-JAX f32 reference mirroring the PyTorch forward (eval-mode dropout)."""
    wq, bq, wk, bk, wv, bv, wo, bo = params
    B, S, d_model = query.shape
    d_k = d_model // h

    def proj(x, w, b):
        y = x @ w + b                                          # [B, S, d_model]
        return y.reshape(B, S, h, d_k).transpose(0, 2, 1, 3)   # [B, h, S, d_k]

    q = proj(query, wq, bq)
    k = proj(key, wk, bk)
    v = proj(value, wv, bv)

    scores = jnp.einsum("bhqd,bhkd->bhqk", q, k) / math.sqrt(d_k)
    p = jax.nn.softmax(scores, axis=-1)
    x = jnp.einsum("bhqk,bhkd->bhqd", p, v)
    x = x.transpose(0, 2, 1, 3).reshape(B, S, d_model)
    return x @ wo + bo


def init_params(key, d_model):
    """Deterministic init mimicking nn.Linear (uniform +-1/sqrt(in_features))."""
    bound = 1.0 / math.sqrt(d_model)
    keys = jax.random.split(key, 8)
    params = []
    for i in range(4):  # linear_q, linear_k, linear_v, linear_out
        w = jax.random.uniform(keys[2 * i], (d_model, d_model),
                               minval=-bound, maxval=bound, dtype=jnp.float32)
        b = jax.random.uniform(keys[2 * i + 1], (1, d_model),
                               minval=-bound, maxval=bound, dtype=jnp.float32)
        params += [w, b]
    return tuple(params)


if __name__ == "__main__":
    B, S, d_model, h = 2, 8, 32, 4

    root = jax.random.PRNGKey(0)
    k_p, k_q, k_k, k_v = jax.random.split(root, 4)

    params = init_params(k_p, d_model)
    prepared = prepare_mha_params(params)   # stacked/cast ONCE, reused per call
    query = jax.random.normal(k_q, (B, S, d_model), dtype=jnp.float32)
    key_t = jax.random.normal(k_k, (B, S, d_model), dtype=jnp.float32)
    value = jax.random.normal(k_v, (B, S, d_model), dtype=jnp.float32)

    out = multihead_attention(query, key_t, value, prepared, h)
    out = jax.block_until_ready(out)

    ref = reference_mha(query, key_t, value, params, h)
    assert out.shape == (B, S, d_model)
    # bf16 MXU inputs + approx reciprocal -> compare against the f32 reference with a
    # correspondingly relaxed tolerance.
    err = jnp.max(jnp.abs(out - ref))
    assert jnp.allclose(out, ref, atol=3e-2, rtol=3e-2), f"max abs err = {err}"

    print("KERNEL_OK")
</pallas_src>

<mosaic_0001>
module attributes {stable_mosaic.version = 11 : i64} {
  func.func @mha_kernel(%arg0: i32, %arg1: i32, %arg2: memref<1x8x32xbf16, #tpu.memory_space<vmem>>, %arg3: memref<1x8x32xbf16, #tpu.memory_space<vmem>>, %arg4: memref<1x8x32xbf16, #tpu.memory_space<vmem>>, %arg5: memref<3x32x32xbf16, #tpu.memory_space<vmem>>, %arg6: memref<3x1x32xf32, #tpu.memory_space<vmem>>, %arg7: memref<32x32xbf16, #tpu.memory_space<vmem>>, %arg8: memref<1x32xf32, #tpu.memory_space<vmem>>, %arg9: memref<1x8x32xf32, #tpu.memory_space<vmem>>, %arg10: memref<8x32xbf16, #tpu.memory_space<vmem>>, %arg11: memref<8x32xbf16, #tpu.memory_space<vmem>>, %arg12: memref<8x32xbf16, #tpu.memory_space<vmem>>) attributes {dimension_semantics = [#tpu.dimension_semantics<parallel>, #tpu.dimension_semantics<arbitrary>], iteration_bounds = array<i64: 2, 1>, scalar_prefetch = 0 : i64, scratch_operands = 3 : i64, tpu.core_type = #tpu.core_type<tc>, window_params = [{transform_indices = @transform_0, window_bounds = array<i64: 1, 8, 32>}, {transform_indices = @transform_1, window_bounds = array<i64: 1, 8, 32>}, {transform_indices = @transform_2, window_bounds = array<i64: 1, 8, 32>}, {pipeline_mode = #tpu.pipeline_mode<synchronous>, transform_indices = @transform_3, window_bounds = array<i64: 3, 32, 32>}, {pipeline_mode = #tpu.pipeline_mode<synchronous>, transform_indices = @transform_4, window_bounds = array<i64: 3, 1, 32>}, {pipeline_mode = #tpu.pipeline_mode<synchronous>, transform_indices = @transform_5, window_bounds = array<i64: 32, 32>}, {pipeline_mode = #tpu.pipeline_mode<synchronous>, transform_indices = @transform_6, window_bounds = array<i64: 1, 32>}, {transform_indices = @transform_7, window_bounds = array<i64: 1, 8, 32>}]} {
    %c0_i32 = arith.constant 0 : i32
    %0 = arith.cmpi eq, %arg1, %c0_i32 : i32
    %1 = arith.extui %0 : i1 to i32
    %c0_i32_0 = arith.constant 0 : i32
    %2 = arith.cmpi ne, %1, %c0_i32_0 : i32
    scf.if %2 {
      %c0_69 = arith.constant 0 : index
      %c0_70 = arith.constant 0 : index
      %c0_71 = arith.constant 0 : index
      %140 = vector.load %arg3[%c0_69, %c0_70, %c0_71] : memref<1x8x32xbf16, #tpu.memory_space<vmem>>, vector<1x8x32xbf16>
      %141 = vector.shape_cast %140 : vector<1x8x32xbf16> to vector<8x32xbf16>
      %c1 = arith.constant 1 : index
      %c0_72 = arith.constant 0 : index
      %c0_73 = arith.constant 0 : index
      %142 = vector.load %arg5[%c1, %c0_72, %c0_73] : memref<3x32x32xbf16, #tpu.memory_space<vmem>>, vector<1x32x32xbf16>
      %143 = vector.shape_cast %142 : vector<1x32x32xbf16> to vector<32x32xbf16>
      %cst_74 = arith.constant dense<0.000000e+00> : vector<8x32xf32>
      %144 = tpu.matmul %141, %143, %cst_74 {dimension_numbers = #tpu.dot_dimension_numbers<[1], [0], [0], [1], [0, 0, 1, 1], [], []>} : vector<8x32xbf16>, vector<32x32xbf16>, vector<8x32xf32> -> vector<8x32xf32>
      %c1_75 = arith.constant 1 : index
      %c0_76 = arith.constant 0 : index
      %c0_77 = arith.constant 0 : index
      %145 = vector.load %arg6[%c1_75, %c0_76, %c0_77] : memref<3x1x32xf32, #tpu.memory_space<vmem>>, vector<1x1x32xf32>
      %146 = vector.shape_cast %145 : vector<1x1x32xf32> to vector<1x32xf32>
      %147 = vector.broadcast %146 : vector<1x32xf32> to vector<8x32xf32>
      %148 = arith.addf %144, %147 : vector<8x32xf32>
      %c0_78 = arith.constant 0 : index
      %c0_79 = arith.constant 0 : index
      %c0_80 = arith.constant 0 : index
      %149 = vector.load %arg4[%c0_78, %c0_79, %c0_80] : memref<1x8x32xbf16, #tpu.memory_space<vmem>>, vector<1x8x32xbf16>
      %150 = vector.shape_cast %149 : vector<1x8x32xbf16> to vector<8x32xbf16>
      %c2 = arith.constant 2 : index
      %c0_81 = arith.constant 0 : index
      %c0_82 = arith.constant 0 : index
      %151 = vector.load %arg5[%c2, %c0_81, %c0_82] : memref<3x32x32xbf16, #tpu.memory_space<vmem>>, vector<1x32x32xbf16>
      %152 = vector.shape_cast %151 : vector<1x32x32xbf16> to vector<32x32xbf16>
      %cst_83 = arith.constant dense<0.000000e+00> : vector<8x32xf32>
      %153 = tpu.matmul %150, %152, %cst_83 {dimension_numbers = #tpu.dot_dimension_numbers<[1], [0], [0], [1], [0, 0, 1, 1], [], []>} : vector<8x32xbf16>, vector<32x32xbf16>, vector<8x32xf32> -> vector<8x32xf32>
      %c2_84 = arith.constant 2 : index
      %c0_85 = arith.constant 0 : index
      %c0_86 = arith.constant 0 : index
      %154 = vector.load %arg6[%c2_84, %c0_85, %c0_86] : memref<3x1x32xf32, #tpu.memory_space<vmem>>, vector<1x1x32xf32>
      %155 = vector.shape_cast %154 : vector<1x1x32xf32> to vector<1x32xf32>
      %156 = vector.broadcast %155 : vector<1x32xf32> to vector<8x32xf32>
      %157 = arith.addf %153, %156 : vector<8x32xf32>
      %158 = arith.truncf %148 : vector<8x32xf32> to vector<8x32xbf16>
      %c0_87 = arith.constant 0 : index
      %c0_88 = arith.constant 0 : index
      %159 = vector.load %arg10[%c0_87, %c0_88] : memref<8x32xbf16, #tpu.memory_space<vmem>>, vector<8x32xbf16>
      tpu.vector_store %arg10[%c0_87, %c0_88], %158 {strides = array<i32>} : memref<8x32xbf16, #tpu.memory_space<vmem>>, vector<8x32xbf16>,
      %160 = arith.truncf %157 : vector<8x32xf32> to vector<8x32xbf16>
      %c0_89 = arith.constant 0 : index
      %c0_90 = arith.constant 0 : index
      %161 = vector.load %arg11[%c0_89, %c0_90] : memref<8x32xbf16, #tpu.memory_space<vmem>>, vector<8x32xbf16>
      tpu.vector_store %arg11[%c0_89, %c0_90], %160 {strides = array<i32>} : memref<8x32xbf16, #tpu.memory_space<vmem>>, vector<8x32xbf16>,
    } else {
    }
    %c0 = arith.constant 0 : index
    %c0_1 = arith.constant 0 : index
    %c0_2 = arith.constant 0 : index
    %3 = vector.load %arg2[%c0, %c0_1, %c0_2] : memref<1x8x32xbf16, #tpu.memory_space<vmem>>, vector<1x8x32xbf16>
    %4 = vector.shape_cast %3 : vector<1x8x32xbf16> to vector<8x32xbf16>
    %c0_3 = arith.constant 0 : index
    %c0_4 = arith.constant 0 : index
    %c0_5 = arith.constant 0 : index
    %5 = vector.load %arg5[%c0_3, %c0_4, %c0_5] : memref<3x32x32xbf16, #tpu.memory_space<vmem>>, vector<1x32x32xbf16>
    %6 = vector.shape_cast %5 : vector<1x32x32xbf16> to vector<32x32xbf16>
    %cst = arith.constant dense<0.000000e+00> : vector<8x32xf32>
    %7 = tpu.matmul %4, %6, %cst {dimension_numbers = #tpu.dot_dimension_numbers<[1], [0], [0], [1], [0, 0, 1, 1], [], []>} : vector<8x32xbf16>, vector<32x32xbf16>, vector<8x32xf32> -> vector<8x32xf32>
    %c0_6 = arith.constant 0 : index
    %c0_7 = arith.constant 0 : index
    %c0_8 = arith.constant 0 : index
    %8 = vector.load %arg6[%c0_6, %c0_7, %c0_8] : memref<3x1x32xf32, #tpu.memory_space<vmem>>, vector<1x1x32xf32>
    %9 = vector.shape_cast %8 : vector<1x1x32xf32> to vector<1x32xf32>
    %10 = vector.broadcast %9 : vector<1x32xf32> to vector<8x32xf32>
    %11 = arith.addf %7, %10 : vector<8x32xf32>
    %cst_9 = arith.constant 0.353553385 : f32
    %12 = vector.broadcast %cst_9 : f32 to vector<8x32xf32>
    %13 = arith.mulf %11, %12 : vector<8x32xf32>
    %14 = arith.truncf %13 : vector<8x32xf32> to vector<8x32xbf16>
    %15 = vector.extract_strided_slice %14 {offsets = [0, 0], sizes = [8, 8], strides = [1, 1]} : vector<8x32xbf16> to vector<8x8xbf16>
    %cst_10 = arith.constant 0xFF800000 : f32
    %16 = vector.broadcast %cst_10 : f32 to vector<8x1xf32>
    %cst_11 = arith.constant 0.000000e+00 : f32
    %17 = vector.broadcast %cst_11 : f32 to vector<8x1xf32>
    %cst_12 = arith.constant 0.000000e+00 : f32
    %18 = vector.broadcast %cst_12 : f32 to vector<8x8xf32>
    %c0_13 = arith.constant 0 : index
    %c0_14 = arith.constant 0 : index
    %19 = vector.load %arg10[%c0_13, %c0_14] : memref<8x32xbf16, #tpu.memory_space<vmem>>, vector<8x8xbf16>
    %c0_15 = arith.constant 0 : index
    %c0_16 = arith.constant 0 : index
    %20 = vector.load %arg11[%c0_15, %c0_16] : memref<8x32xbf16, #tpu.memory_space<vmem>>, vector<8x8xbf16>
    %cst_17 = arith.constant dense<0.000000e+00> : vector<8x8xf32>
    %21 = tpu.matmul %15, %19, %cst_17 {dimension_numbers = #tpu.dot_dimension_numbers<[1], [1], [0], [0], [0, 0, 1, 0], [], []>} : vector<8x8xbf16>, vector<8x8xbf16>, vector<8x8xf32> -> vector<8x8xf32>
    %cst_18 = arith.constant dense<0xFF800000> : vector<8xf32>
    %22 = vector.multi_reduction <maximumf>, %21, %cst_18 [1] : vector<8x8xf32> to vector<8xf32>
    %23 = vector.shape_cast %22 : vector<8xf32> to vector<8x1xf32>
    %24 = arith.maximumf %16, %23 : vector<8x1xf32>
    %25 = arith.subf %16, %24 : vector<8x1xf32>
    %26 = math.exp %25 : vector<8x1xf32>
    %27 = vector.broadcast %24 : vector<8x1xf32> to vector<8x8xf32>
    %28 = arith.subf %21, %27 : vector<8x8xf32>
    %29 = math.exp %28 : vector<8x8xf32>
    %30 = arith.mulf %26, %17 : vector<8x1xf32>
    %cst_19 = arith.constant dense<0.000000e+00> : vector<8xf32>
    %31 = vector.multi_reduction <add>, %29, %cst_19 [1] : vector<8x8xf32> to vector<8xf32>
    %32 = vector.shape_cast %31 : vector<8xf32> to vector<8x1xf32>
    %33 = arith.addf %30, %32 : vector<8x1xf32>
    %34 = vector.broadcast %26 : vector<8x1xf32> to vector<8x8xf32>
    %35 = arith.mulf %34, %18 : vector<8x8xf32>
    %36 = arith.truncf %29 : vector<8x8xf32> to vector<8x8xbf16>
    %cst_20 = arith.constant dense<0.000000e+00> : vector<8x8xf32>
    %37 = tpu.matmul %36, %20, %cst_20 {dimension_numbers = #tpu.dot_dimension_numbers<[1], [0], [0], [1], [0, 0, 1, 1], [], []>} : vector<8x8xbf16>, vector<8x8xbf16>, vector<8x8xf32> -> vector<8x8xf32>
    %38 = arith.addf %35, %37 : vector<8x8xf32>
    %39 = tpu.reciprocal %33 {approx = true} : vector<8x1xf32> -> vector<8x1xf32>
    %40 = vector.broadcast %39 : vector<8x1xf32> to vector<8x8xf32>
    %41 = arith.mulf %38, %40 : vector<8x8xf32>
    %42 = arith.truncf %41 : vector<8x8xf32> to vector<8x8xbf16>
    %c0_21 = arith.constant 0 : index
    %c0_22 = arith.constant 0 : index
    %43 = vector.load %arg12[%c0_21, %c0_22] : memref<8x32xbf16, #tpu.memory_space<vmem>>, vector<8x8xbf16>
    tpu.vector_store %arg12[%c0_21, %c0_22], %42 {strides = array<i32>} : memref<8x32xbf16, #tpu.memory_space<vmem>>, vector<8x8xbf16>,
    %44 = vector.extract_strided_slice %14 {offsets = [0, 8], sizes = [8, 8], strides = [1, 1]} : vector<8x32xbf16> to vector<8x8xbf16>
    %cst_23 = arith.constant 0xFF800000 : f32
    %45 = vector.broadcast %cst_23 : f32 to vector<8x1xf32>
    %cst_24 = arith.constant 0.000000e+00 : f32
    %46 = vector.broadcast %cst_24 : f32 to vector<8x1xf32>
    %cst_25 = arith.constant 0.000000e+00 : f32
    %47 = vector.broadcast %cst_25 : f32 to vector<8x8xf32>
    %c0_26 = arith.constant 0 : index
    %c8 = arith.constant 8 : index
    %48 = vector.load %arg10[%c0_26, %c8] : memref<8x32xbf16, #tpu.memory_space<vmem>>, vector<8x8xbf16>
    %c0_27 = arith.constant 0 : index
    %c8_28 = arith.constant 8 : index
    %49 = vector.load %arg11[%c0_27, %c8_28] : memref<8x32xbf16, #tpu.memory_space<vmem>>, vector<8x8xbf16>
    %cst_29 = arith.constant dense<0.000000e+00> : vector<8x8xf32>
    %50 = tpu.matmul %44, %48, %cst_29 {dimension_numbers = #tpu.dot_dimension_numbers<[1], [1], [0], [0], [0, 0, 1, 0], [], []>} : vector<8x8xbf16>, vector<8x8xbf16>, vector<8x8xf32> -> vector<8x8xf32>
    %cst_30 = arith.constant dense<0xFF800000> : vector<8xf32>
    %51 = vector.multi_reduction <maximumf>, %50, %cst_30 [1] : vector<8x8xf32> to vector<8xf32>
    %52 = vector.shape_cast %51 : vector<8xf32> to vector<8x1xf32>
    %53 = arith.maximumf %45, %52 : vector<8x1xf32>
    %54 = arith.subf %45, %53 : vector<8x1xf32>
    %55 = math.exp %54 : vector<8x1xf32>
    %56 = vector.broadcast %53 : vector<8x1xf32> to vector<8x8xf32>
    %57 = arith.subf %50, %56 : vector<8x8xf32>
    %58 = math.exp %57 : vector<8x8xf32>
    %59 = arith.mulf %55, %46 : vector<8x1xf32>
    %cst_31 = arith.constant dense<0.000000e+00> : vector<8xf32>
    %60 = vector.multi_reduction <add>, %58, %cst_31 [1] : vector<8x8xf32> to vector<8xf32>
    %61 = vector.shape_cast %60 : vector<8xf32> to vector<8x1xf32>
    %62 = arith.addf %59, %61 : vector<8x1xf32>
    %63 = vector.broadcast %55 : vector<8x1xf32> to vector<8x8xf32>
    %64 = arith.mulf %63, %47 : vector<8x8xf32>
    %65 = arith.truncf %58 : vector<8x8xf32> to vector<8x8xbf16>
    %cst_32 = arith.constant dense<0.000000e+00> : vector<8x8xf32>
    %66 = tpu.matmul %65, %49, %cst_32 {dimension_numbers = #tpu.dot_dimension_numbers<[1], [0], [0], [1], [0, 0, 1, 1], [], []>} : vector<8x8xbf16>, vector<8x8xbf16>, vector<8x8xf32> -> vector<8x8xf32>
    %67 = arith.addf %64, %66 : vector<8x8xf32>
    %68 = tpu.reciprocal %62 {approx = true} : vector<8x1xf32> -> vector<8x1xf32>
    %69 = vector.broadcast %68 : vector<8x1xf32> to vector<8x8xf32>
    %70 = arith.mulf %67, %69 : vector<8x8xf32>
    %71 = arith.truncf %70 : vector<8x8xf32> to vector<8x8xbf16>
    %c0_33 = arith.constant 0 : index
    %c8_34 = arith.constant 8 : index
    %72 = vector.load %arg12[%c0_33, %c8_34] : memref<8x32xbf16, #tpu.memory_space<vmem>>, vector<8x8xbf16>
    tpu.vector_store %arg12[%c0_33, %c8_34], %71 {strides = array<i32>} : memref<8x32xbf16, #tpu.memory_space<vmem>>, vector<8x8xbf16>,
    %73 = vector.extract_strided_slice %14 {offsets = [0, 16], sizes = [8, 8], strides = [1, 1]} : vector<8x32xbf16> to vector<8x8xbf16>
    %cst_35 = arith.constant 0xFF800000 : f32
    %74 = vector.broadcast %cst_35 : f32 to vector<8x1xf32>
    %cst_36 = arith.constant 0.000000e+00 : f32
    %75 = vector.broadcast %cst_36 : f32 to vector<8x1xf32>
    %cst_37 = arith.constant 0.000000e+00 : f32
    %76 = vector.broadcast %cst_37 : f32 to vector<8x8xf32>
    %c0_38 = arith.constant 0 : index
    %c16 = arith.constant 16 : index
    %77 = vector.load %arg10[%c0_38, %c16] : memref<8x32xbf16, #tpu.memory_space<vmem>>, vector<8x8xbf16>
    %c0_39 = arith.constant 0 : index
    %c16_40 = arith.constant 16 : index
    %78 = vector.load %arg11[%c0_39, %c16_40] : memref<8x32xbf16, #tpu.memory_space<vmem>>, vector<8x8xbf16>
    %cst_41 = arith.constant dense<0.000000e+00> : vector<8x8xf32>
    %79 = tpu.matmul %73, %77, %cst_41 {dimension_numbers = #tpu.dot_dimension_numbers<[1], [1], [0], [0], [0, 0, 1, 0], [], []>} : vector<8x8xbf16>, vector<8x8xbf16>, vector<8x8xf32> -> vector<8x8xf32>
    %cst_42 = arith.constant dense<0xFF800000> : vector<8xf32>
    %80 = vector.multi_reduction <maximumf>, %79, %cst_42 [1] : vector<8x8xf32> to vector<8xf32>
    %81 = vector.shape_cast %80 : vector<8xf32> to vector<8x1xf32>
    %82 = arith.maximumf %74, %81 : vector<8x1xf32>
    %83 = arith.subf %74, %82 : vector<8x1xf32>
    %84 = math.exp %83 : vector<8x1xf32>
    %85 = vector.broadcast %82 : vector<8x1xf32> to vector<8x8xf32>
    %86 = arith.subf %79, %85 : vector<8x8xf32>
    %87 = math.exp %86 : vector<8x8xf32>
    %88 = arith.mulf %84, %75 : vector<8x1xf32>
    %cst_43 = arith.constant dense<0.000000e+00> : vector<8xf32>
    %89 = vector.multi_reduction <add>, %87, %cst_43 [1] : vector<8x8xf32> to vector<8xf32>
    %90 = vector.shape_cast %89 : vector<8xf32> to vector<8x1xf32>
    %91 = arith.addf %88, %90 : vector<8x1xf32>
    %92 = vector.broadcast %84 : vector<8x1xf32> to vector<8x8xf32>
    %93 = arith.mulf %92, %76 : vector<8x8xf32>
    %94 = arith.truncf %87 : vector<8x8xf32> to vector<8x8xbf16>
    %cst_44 = arith.constant dense<0.000000e+00> : vector<8x8xf32>
    %95 = tpu.matmul %94, %78, %cst_44 {dimension_numbers = #tpu.dot_dimension_numbers<[1], [0], [0], [1], [0, 0, 1, 1], [], []>} : vector<8x8xbf16>, vector<8x8xbf16>, vector<8x8xf32> -> vector<8x8xf32>
    %96 = arith.addf %93, %95 : vector<8x8xf32>
    %97 = tpu.reciprocal %91 {approx = true} : vector<8x1xf32> -> vector<8x1xf32>
    %98 = vector.broadcast %97 : vector<8x1xf32> to vector<8x8xf32>
    %99 = arith.mulf %96, %98 : vector<8x8xf32>
    %100 = arith.truncf %99 : vector<8x8xf32> to vector<8x8xbf16>
    %c0_45 = arith.constant 0 : index
    %c16_46 = arith.constant 16 : index
    %101 = vector.load %arg12[%c0_45, %c16_46] : memref<8x32xbf16, #tpu.memory_space<vmem>>, vector<8x8xbf16>
    tpu.vector_store %arg12[%c0_45, %c16_46], %100 {strides = array<i32>} : memref<8x32xbf16, #tpu.memory_space<vmem>>, vector<8x8xbf16>,
    %102 = vector.extract_strided_slice %14 {offsets = [0, 24], sizes = [8, 8], strides = [1, 1]} : vector<8x32xbf16> to vector<8x8xbf16>
    %cst_47 = arith.constant 0xFF800000 : f32
    %103 = vector.broadcast %cst_47 : f32 to vector<8x1xf32>
    %cst_48 = arith.constant 0.000000e+00 : f32
    %104 = vector.broadcast %cst_48 : f32 to vector<8x1xf32>
    %cst_49 = arith.constant 0.000000e+00 : f32
    %105 = vector.broadcast %cst_49 : f32 to vector<8x8xf32>
    %c0_50 = arith.constant 0 : index
    %c24 = arith.constant 24 : index
    %106 = vector.load %arg10[%c0_50, %c24] : memref<8x32xbf16, #tpu.memory_space<vmem>>, vector<8x8xbf16>
    %c0_51 = arith.constant 0 : index
    %c24_52 = arith.constant 24 : index
    %107 = vector.load %arg11[%c0_51, %c24_52] : memref<8x32xbf16, #tpu.memory_space<vmem>>, vector<8x8xbf16>
    %cst_53 = arith.constant dense<0.000000e+00> : vector<8x8xf32>
    %108 = tpu.matmul %102, %106, %cst_53 {dimension_numbers = #tpu.dot_dimension_numbers<[1], [1], [0], [0], [0, 0, 1, 0], [], []>} : vector<8x8xbf16>, vector<8x8xbf16>, vector<8x8xf32> -> vector<8x8xf32>
    %cst_54 = arith.constant dense<0xFF800000> : vector<8xf32>
    %109 = vector.multi_reduction <maximumf>, %108, %cst_54 [1] : vector<8x8xf32> to vector<8xf32>
    %110 = vector.shape_cast %109 : vector<8xf32> to vector<8x1xf32>
    %111 = arith.maximumf %103, %110 : vector<8x1xf32>
    %112 = arith.subf %103, %111 : vector<8x1xf32>
    %113 = math.exp %112 : vector<8x1xf32>
    %114 = vector.broadcast %111 : vector<8x1xf32> to vector<8x8xf32>
    %115 = arith.subf %108, %114 : vector<8x8xf32>
    %116 = math.exp %115 : vector<8x8xf32>
    %117 = arith.mulf %113, %104 : vector<8x1xf32>
    %cst_55 = arith.constant dense<0.000000e+00> : vector<8xf32>
    %118 = vector.multi_reduction <add>, %116, %cst_55 [1] : vector<8x8xf32> to vector<8xf32>
    %119 = vector.shape_cast %118 : vector<8xf32> to vector<8x1xf32>
    %120 = arith.addf %117, %119 : vector<8x1xf32>
    %121 = vector.broadcast %113 : vector<8x1xf32> to vector<8x8xf32>
    %122 = arith.mulf %121, %105 : vector<8x8xf32>
    %123 = arith.truncf %116 : vector<8x8xf32> to vector<8x8xbf16>
    %cst_56 = arith.constant dense<0.000000e+00> : vector<8x8xf32>
    %124 = tpu.matmul %123, %107, %cst_56 {dimension_numbers = #tpu.dot_dimension_numbers<[1], [0], [0], [1], [0, 0, 1, 1], [], []>} : vector<8x8xbf16>, vector<8x8xbf16>, vector<8x8xf32> -> vector<8x8xf32>
    %125 = arith.addf %122, %124 : vector<8x8xf32>
    %126 = tpu.reciprocal %120 {approx = true} : vector<8x1xf32> -> vector<8x1xf32>
    %127 = vector.broadcast %126 : vector<8x1xf32> to vector<8x8xf32>
    %128 = arith.mulf %125, %127 : vector<8x8xf32>
    %129 = arith.truncf %128 : vector<8x8xf32> to vector<8x8xbf16>
    %c0_57 = arith.constant 0 : index
    %c24_58 = arith.constant 24 : index
    %130 = vector.load %arg12[%c0_57, %c24_58] : memref<8x32xbf16, #tpu.memory_space<vmem>>, vector<8x8xbf16>
    tpu.vector_store %arg12[%c0_57, %c24_58], %129 {strides = array<i32>} : memref<8x32xbf16, #tpu.memory_space<vmem>>, vector<8x8xbf16>,
    %c0_59 = arith.constant 0 : index
    %c0_60 = arith.constant 0 : index
    %131 = vector.load %arg12[%c0_59, %c0_60] : memref<8x32xbf16, #tpu.memory_space<vmem>>, vector<8x32xbf16>
    %c0_61 = arith.constant 0 : index
    %c0_62 = arith.constant 0 : index
    %132 = vector.load %arg7[%c0_61, %c0_62] : memref<32x32xbf16, #tpu.memory_space<vmem>>, vector<32x32xbf16>
    %cst_63 = arith.constant dense<0.000000e+00> : vector<8x32xf32>
    %133 = tpu.matmul %131, %132, %cst_63 {dimension_numbers = #tpu.dot_dimension_numbers<[1], [0], [0], [1], [0, 0, 1, 1], [], []>} : vector<8x32xbf16>, vector<32x32xbf16>, vector<8x32xf32> -> vector<8x32xf32>
    %c0_64 = arith.constant 0 : index
    %c0_65 = arith.constant 0 : index
    %134 = vector.load %arg8[%c0_64, %c0_65] : memref<1x32xf32, #tpu.memory_space<vmem>>, vector<1x32xf32>
    %135 = vector.broadcast %134 : vector<1x32xf32> to vector<8x32xf32>
    %136 = arith.addf %133, %135 : vector<8x32xf32>
    %c0_66 = arith.constant 0 : index
    %c0_67 = arith.constant 0 : index
    %c0_68 = arith.constant 0 : index
    %137 = vector.load %arg9[%c0_66, %c0_67, %c0_68] : memref<1x8x32xf32, #tpu.memory_space<vmem>>, vector<1x8x32xf32>
    %138 = vector.shape_cast %137 : vector<1x8x32xf32> to vector<8x32xf32>
    %139 = vector.shape_cast %136 : vector<8x32xf32> to vector<1x8x32xf32>
    tpu.vector_store %arg9[%c0_66, %c0_67, %c0_68], %139 {strides = array<i32>} : memref<1x8x32xf32, #tpu.memory_space<vmem>>, vector<1x8x32xf32>,
    return
  }
  func.func @transform_0(%arg0: i32, %arg1: i32) -> (i32, i32, i32) {
    %c0_i32 = arith.constant 0 : i32
    %c0_i32_0 = arith.constant 0 : i32
    return %arg0, %arg1, %c0_i32 : i32, i32, i32
  }
  func.func @transform_1(%arg0: i32, %arg1: i32) -> (i32, i32, i32) {
    %c0_i32 = arith.constant 0 : i32
    %c0_i32_0 = arith.constant 0 : i32
    %c0_i32_1 = arith.constant 0 : i32
    return %arg0, %c0_i32, %c0_i32_0 : i32, i32, i32
  }
  func.func @transform_2(%arg0: i32, %arg1: i32) -> (i32, i32, i32) {
    %c0_i32 = arith.constant 0 : i32
    %c0_i32_0 = arith.constant 0 : i32
    %c0_i32_1 = arith.constant 0 : i32
    return %arg0, %c0_i32, %c0_i32_0 : i32, i32, i32
  }
  func.func @transform_3(%arg0: i32, %arg1: i32) -> (i32, i32, i32) {
    %c0_i32 = arith.constant 0 : i32
    %c0_i32_0 = arith.constant 0 : i32
    %c0_i32_1 = arith.constant 0 : i32
    %c0_i32_2 = arith.constant 0 : i32
    return %c0_i32, %c0_i32_0, %c0_i32_1 : i32, i32, i32
  }
  func.func @transform_4(%arg0: i32, %arg1: i32) -> (i32, i32, i32) {
    %c0_i32 = arith.constant 0 : i32
    %c0_i32_0 = arith.constant 0 : i32
    %c0_i32_1 = arith.constant 0 : i32
    %c0_i32_2 = arith.constant 0 : i32
    return %c0_i32, %c0_i32_0, %c0_i32_1 : i32, i32, i32
  }
  func.func @transform_5(%arg0: i32, %arg1: i32) -> (i32, i32) {
    %c0_i32 = arith.constant 0 : i32
    %c0_i32_0 = arith.constant 0 : i32
    %c0_i32_1 = arith.constant 0 : i32
    return %c0_i32, %c0_i32_0 : i32, i32
  }
  func.func @transform_6(%arg0: i32, %arg1: i32) -> (i32, i32) {
    %c0_i32 = arith.constant 0 : i32
    %c0_i32_0 = arith.constant 0 : i32
    %c0_i32_1 = arith.constant 0 : i32
    return %c0_i32, %c0_i32_0 : i32, i32
  }
  func.func @transform_7(%arg0: i32, %arg1: i32) -> (i32, i32, i32) {
    %c0_i32 = arith.constant 0 : i32
    %c0_i32_0 = arith.constant 0 : i32
    return %arg0, %arg1, %c0_i32 : i32, i32, i32
  }
}

</mosaic_0001>

<bundles_post_ra>
// kernel: tpu_custom_call.1
= control target key start
LH: loop header
LB: loop body
LE: loop exit
PB: predicated region body
PF: predicated region fallthrough
CT: control target
= control target key end

     0   :  { %s2386_s0 = inlined_call_operand.hbm [shape: bf16[2,8,32], index: 0, kind: input, shape index: {}]   ;;  %s2387_s1 = inlined_call_operand.hbm [shape: bf16[2,8,32], index: 1, kind: input, shape index: {}]   ;;  %s2388_s2 = inlined_call_operand.hbm [shape: bf16[2,8,32], index: 2, kind: input, shape index: {}]   ;;  %s2389_s3 = inlined_call_operand.hbm [shape: bf16[3,32,32], index: 3, kind: input, shape index: {}]   ;;  %s2390_s4 = inlined_call_operand.hbm [shape: f32[3,1,32], index: 4, kind: input, shape index: {}]   ;;  %s2391_s5 = inlined_call_operand.vmem [shape: bf16[32,32], index: 5, kind: input, shape index: {}]   ;;  %s2392_s6 = inlined_call_operand.vmem [shape: f32[1,32], index: 6, kind: input, shape index: {}]   ;;  %s2393_s7 = inlined_call_operand.hbm [shape: f32[2,8,32], index: 7, kind: output, shape index: {}]  }
   0x1   :  { %2412 = sst [smem:[#allocation25_spill]] %s2387_s1 }
   0x2   :  { %2413 = sst [smem:[#allocation26_spill]] %s2389_s3 }
   0x3   :  { %12 = vsyncpa [#allocation6], 0 }
   0x4   :  { %14 = vsyncpa [#allocation6 + $0x1], 0 }
   0x5   :  { %15 = vsyncpa [#allocation9], 0 }
   0x6   :  { %17 = vsyncpa [#allocation9 + $0x1], 0 }
   0x7   :  { %18 = vsyncpa [#allocation12], 0 }
   0x8   :  { %19 = vsyncpa [#allocation7], 0 }
   0x9   :  { %21 = vsyncpa [#allocation7 + $0x1], 0  ;;  %s1978_s24 = smov 0   ;;  %s1980_s25 = smov 0  }
   0xa   :  { %s1982_s26 = smov 0   ;;  %s1984_s27 = smov 0  }
   0xb   :  { %s1986_s28 = smov 0   ;;  %s1988_s29 = smov 0  }
   0xc LB: > { %2414 = sst [smem:[#allocation19_spill]] %s1898_s24  ;;  %s2009_s30 = sadd.s32 4294967295, %s1918_s29   ;;  %s1918_s29 = sphi %s1988_s29, %s27_s29   ;;  %s1914_s28 = sphi %s1986_s28, %s2449_s28   ;;  %s1910_s27 = sphi %s1984_s27, %s2448_s27   ;;  %s1906_s26 = sphi %s1982_s26, %s2452_s26   ;;  %s1902_s25 = sphi %s1980_s25, %s2451_s25   ;;  %s1898_s24 = sphi %s1978_s24, %s2450_s24  }
   0xd   : > { %2415 = sst [smem:[#allocation20_spill]] %s1914_s28  ;;  %s1373_s8 = sadd.s32 4294967294, %s1918_s29  }
   0xe   : > { %2416 = sst [smem:[#allocation21_spill]] %s1918_s29  ;;  %p61_p0 = scmp.ne.s32.totalorder %s1902_s25, %s1898_s24 }
   0xf   : > { %p2394_p1 = scmp.eq.s32.totalorder %s2009_s30, 0  ;;  %p229_p3 = scmp.eq.s32.totalorder %s1373_s8, 1 }
  0x10   : > { %p1374_p5 = scmp.ge.s32.totalorder %s1918_s29, 1  ;;  %p236_p7 = scmp.lt.s32.totalorder %s1918_s29, 3 }
  0x11   : > { %p2018_p4 = por %p2394_p1, %p61_p0  ;;  %p2023_p6 = por %p229_p3, %p61_p0 }
  0x12   : > { %p2028_p8 = pnand %p1374_p5, %p236_p7  ;;  %s1920_s12 = smov [#allocation11]  }
  0x13   : > { %s2417_s9 = scalar_select %p2018_p4, 1, 0 }
  0x14   : > { %s2418_s10 = scalar_select %p2023_p6, 1, 0 }
  0x15   : > { %s2420_s11 = scalar_select %p2028_p8, 1, 0 }
  0x16   : > { %2419 = sst [smem:[#allocation22_spill]] %s2418_s10  ;;  %s248_s13 = sshll.u32 %s1920_s12, 4  ;;  %s249_s13 = int_to_ptr.vmem [resolvable:$true] %s248_s13 }
  0x17   : > { %p1555_p9 = pneg %p2028_p8  ;;  %s39_s15 = sadd.s32 1, %s1914_s28 }
  0x18   : > { %s2422_s3 = sld [smem:[#allocation26_spill]] }
  0x19   : > { %p2037_p11 = pnand %p1555_p9, %p2394_p1 }
  0x1b   : > { %s2421_s14 = scalar_select %p2037_p11, 1, 0 }
  0x1c   : > { %p2403_p13 = pneg %p2037_p11 }
  0x1e   : > { %s1682_s18 = scalar_lea.hbm %s2422_s3, 768 }
  0x1f   : > { %p1683_p12 = scmp.ne.s32.totalorder %s2422_s3, %s1682_s18  ;;  %p1689_p5 = scmp.lt.u32.totalorder %s1682_s18, %s2422_s3 }
  0x21   : > { %p1685_p0 = pnand %p2403_p13, %p1683_p12 }
  0x23   : > { %p1686_p3 = pneg %p1685_p0 }
  0x25   : > { %p1691_p7 = pnand %p1689_p5, %p1686_p3 }
  0x27   : > { %1694 = shalt.err (!%p1691_p7)
}
  0x28   : > { %s1695_s23 = scalar_lea.vmem %s249_s13, 768  ;;  %p1703_p2 = scmp.lt.s32.totalorder %s249_s13, %s249_s13 }
  0x29   : > { %p1696_p9 = scmp.ne.s32.totalorder %s249_s13, %s1695_s23  ;;  %p1704_p6 = scmp.lt.s32.totalorder %s1695_s23, %s1695_s23 }
  0x2b   : > { %p1698_p10 = pnand %p1696_p9, %p2403_p13  ;;  %p1705_p4 = por %p1704_p6, %p1703_p2 }
  0x2d   : > { %p1699_p1 = pneg %p1698_p10 }
  0x2f   : > { %p1706_p8 = pnand %p1705_p4, %p1699_p1 }
  0x31   : > { %1709 = shalt.err (!%p1706_p8)
}
  0x32   : > { %s1921_s8 = smov 64   ;;  %s1922_s12 = smov 4  }
  0x33   : > { %1558 = dma.hbm_to_vmem [thread:$0]  (!%p2037_p11), %s2422_s3, 768, %s249_s13, [#allocation12], %s1921_s8, %s1921_s8, %s1922_s12  }
  0x34   : > { %p41_p1 = scmp.ge.s32.totalorder %s39_s15, 2  ;;  %s48_s18 = sadd.s32 1, %s1906_s26 }
  0x35   : > { %p55_p2 = scmp.ne.s32.totalorder %s1906_s26, %s1902_s25  ;;  %p56_p4 = scmp.eq.s32.totalorder %s1918_s29, 0 }
  0x36   : > { %s2454_s15 = smov (%p41_p1, %s39_s15), 0  ;;  %p2424_p8 = scmp.eq.s32.totalorder %s2009_s30, 1 }
  0x37   : > { %2423 = sst [smem:[#allocation23_spill]] %s2454_s15  ;;  %p57_p6 = por %p56_p4, %p55_p2 }
  0x38   : > { %p2072_p10 = por %p2424_p8, %p55_p2  ;;  %s43_s20 = ssub.s32 %s1914_s28, %s2454_s15 }
  0x39   : > { %p1578_p12 = scmp.lt.s32.totalorder %s1918_s29, 2  ;;  %p46_p0 = scmp.eq.s32.totalorder %s43_s20, 0 }
  0x3a   : > { %s2425_s19 = scalar_select %p2072_p10, 1, 0 }
  0x3b   : > { %s2397_s21 = sand.u32 1, %s1906_s26   ;;  %s2085_s22 = sshll.u32 %s1914_s28, 6 }
  0x3c   : > { %s2082_s13 = sshll.u32 %s2397_s21, 2  ;;  %p2090_p3 = pnand %p1578_p12, %p57_p6 }
  0x3d   : > { %s2088_s23 = scalar_select %p46_p0, %s1906_s26, %s48_s18  }
  0x3e   : > { %s2427_s8 = scalar_select %p2090_p3, 1, 0 }
  0x3f   : > { %2426 = sst [smem:[#allocation24_spill]] %s2088_s23  ;;  %s300_s12 = sand.u32 1, %s1918_s29  }
  0x40   : > { %s2428_s1 = sld [smem:[#allocation25_spill]]  ;;  %s304_s21 = scalar_lea.vmem [#allocation8], %s2082_s13 }
  0x41   : > { %s311_s3 = sshll.u32 %s304_s21, 4  ;;  %s1923_s18 = smov [#allocation13]   ;;  %s2102_s3 = int_to_ptr.vmem [resolvable:$true] %s311_s3 }
  0x42   : > { %s2104_s15 = sshll.u32 %s1923_s18, 4  ;;  %s2106_s28 = scalar_lea.sflag [#allocation9], %s300_s12  ;;  %s262_s15 = int_to_ptr.vmem [resolvable:$true] %s2104_s15 }
  0x43   : > { %p2112_p7 = pneg %p2090_p3 }
  0x45   : > { %s2429_s16 = scalar_select %p2112_p7, 1, 0 }
  0x46   : > { %s2099_s20 = scalar_lea.hbm %s2428_s1, %s2085_s22  ;;  %s1715_s29 = scalar_lea.hbm %s2428_s1, 128 }
  0x47   : > { %s1710_s23 = scalar_lea.hbm %s2099_s20, 64  ;;  %p1716_p2 = scmp.lt.u32.totalorder %s2099_s20, %s2428_s1 }
  0x48   : > { %p1711_p5 = scmp.ne.s32.totalorder %s2099_s20, %s1710_s23  ;;  %p1717_p4 = scmp.lt.u32.totalorder %s1715_s29, %s1710_s23 }
  0x49   : > { %p1719_p8 = scmp.lt.u32.totalorder %s1710_s23, %s2099_s20 }
  0x4a   : > { %p1713_p9 = pnand %p2112_p7, %p1711_p5  ;;  %p1718_p6 = por %p1717_p4, %p1716_p2 }
  0x4c   : > { %p1714_p1 = pneg %p1713_p9  ;;  %p1720_p12 = por %p1719_p8, %p1718_p6 }
  0x4e   : > { %p1721_p0 = pnand %p1720_p12, %p1714_p1 }
  0x50   : > { %1724 = shalt.err (!%p1721_p0)
}
  0x51   : > { %s1725_s12 = scalar_lea.vmem %s2102_s3, 64  ;;  %s1924_s17 = smov [#allocation8]  }
  0x52   : > { %p1726_p5 = scmp.ne.s32.totalorder %s2102_s3, %s1725_s12  ;;  %s1730_s21 = sshll.u32 %s1924_s17, 4  ;;  %s1731_s21 = int_to_ptr.vmem [resolvable:$false] %s1730_s21 }
  0x53   : > { %s1732_s10 = scalar_lea.vmem %s1731_s21, 128  ;;  %p1733_p10 = scmp.lt.s32.totalorder %s2102_s3, %s1731_s21 }
  0x54   : > { %p1728_p9 = pnand %p1726_p5, %p2112_p7  ;;  %p1734_p11 = scmp.lt.s32.totalorder %s1732_s10, %s1725_s12 }
  0x56   : > { %p1729_p13 = pneg %p1728_p9  ;;  %p1735_p2 = por %p1734_p11, %p1733_p10 }
  0x58   : > { %p1736_p4 = pnand %p1735_p2, %p1729_p13 }
  0x5a   : > { %1739 = shalt.err (!%p1736_p4)
}
  0x5b   : > { %1568 = dma.hbm_to_vmem [thread:$0]  (!%p2090_p3), %s2099_s20, 64, %s2102_s3, %s2106_s28  }
  0x5c   : > { %s1740_s18 = scalar_lea.hbm %s2390_s4, 48  ;;  %p2430_p11 = scmp.ne.s32.totalorder %s2421_s14, 0 }
  0x5d   : > { %p1741_p1 = scmp.ne.s32.totalorder %s2390_s4, %s1740_s18  ;;  %p1747_p8 = scmp.lt.u32.totalorder %s1740_s18, %s2390_s4 }
  0x5e   : > { %p2431_p13 = pneg %p2430_p11 }
  0x60   : > { %p1743_p10 = pnand %p1741_p1, %p2431_p13 }
  0x62   : > { %p1744_p6 = pneg %p1743_p10 }
  0x64   : > { %p1749_p12 = pnand %p1747_p8, %p1744_p6 }
  0x66   : > { %1752 = shalt.err (!%p1749_p12)
}
  0x67   : > { %s1753_s3 = scalar_lea.vmem %s262_s15, 48  ;;  %p2432_p5 = pmov %p2431_p13 }
  0x68   : > { %p1754_p0 = scmp.ne.s32.totalorder %s262_s15, %s1753_s3  ;;  %s1760_s20 = scalar_lea.vmem %s262_s15, 64 }
  0x69   : > { %p1761_p4 = scmp.lt.s32.totalorder %s262_s15, %s262_s15  ;;  %p1762_p3 = scmp.lt.s32.totalorder %s1760_s20, %s1753_s3 }
  0x6a   : > { %p1756_p9 = pnand %p1754_p0, %p2432_p5 }
  0x6b   : > { %p1763_p7 = por %p1762_p3, %p1761_p4 }
  0x6c   : > { %p1757_p2 = pneg %p1756_p9 }
  0x6e   : > { %p1764_p1 = pnand %p1763_p7, %p1757_p2 }
  0x70   : > { %1767 = shalt.err (!%p1764_p1)
}
  0x71   : > { %s1925_s1 = smov 16   ;;  %s1926_s10 = smov 1  }
  0x72   : > { %1561 = dma.hbm_to_vmem [thread:$0]  (!%p2430_p11), %s2390_s4, 48, %s262_s15, [#allocation12], %s1925_s1, %s1925_s1, %s1926_s10  }
  0x73   : > { %s2161_s12 = scalar_lea.hbm %s2386_s0, %s2085_s22  ;;  %s285_s21 = scalar_lea.vmem [#allocation5], %s2082_s13 }
  0x74   : > { %s293_s3 = sshll.u32 %s285_s21, 4  ;;  %s2170_s14 = scalar_lea.hbm %s2388_s2, %s2085_s22  ;;  %s2164_s3 = int_to_ptr.vmem [resolvable:$true] %s293_s3 }
  0x75   : > { %s2433_s29 = sand.u32 1, %s1906_s26   ;;  %s1768_s1 = scalar_lea.hbm %s2161_s12, 64 }
  0x76   : > { %s282_s15 = scalar_lea.sflag [#allocation6], %s2433_s29  ;;  %p1769_p3 = scmp.ne.s32.totalorder %s2161_s12, %s1768_s1 }
  0x77   : > { %p2434_p7 = scmp.ne.s32.totalorder %s2429_s16, 0  ;;  %s1773_s18 = scalar_lea.hbm %s2386_s0, 128 }
  0x78   : > { %p1774_p10 = scmp.lt.u32.totalorder %s2161_s12, %s2386_s0  ;;  %p1775_p6 = scmp.lt.u32.totalorder %s1773_s18, %s1768_s1 }
  0x79   : > { %p1771_p11 = pnand %p1769_p3, %p2434_p7  ;;  %p1777_p12 = scmp.lt.u32.totalorder %s1768_s1, %s2161_s12 }
  0x7a   : > { %p1776_p8 = por %p1775_p6, %p1774_p10 }
  0x7b   : > { %p1772_p13 = pneg %p1771_p11 }
  0x7c   : > { %p1778_p0 = por %p1777_p12, %p1776_p8 }
  0x7e   : > { %p1779_p5 = pnand %p1778_p0, %p1772_p13 }
  0x80   : > { %1782 = shalt.err (!%p1779_p5)
}
  0x81   : > { %s1783_s24 = scalar_lea.vmem %s2164_s3, 64  ;;  %s1927_s22 = smov [#allocation5]  }
  0x82   : > { %p1784_p9 = scmp.ne.s32.totalorder %s2164_s3, %s1783_s24  ;;  %s1788_s20 = sshll.u32 %s1927_s22, 4  ;;  %s1789_s20 = int_to_ptr.vmem [resolvable:$false] %s1788_s20 }
  0x83   : > { %s1790_s29 = scalar_lea.vmem %s1789_s20, 128  ;;  %p1791_p1 = scmp.lt.s32.totalorder %s2164_s3, %s1789_s20 }
  0x84   : > { %p1786_p2 = pnand %p1784_p9, %p2434_p7  ;;  %p1792_p3 = scmp.lt.s32.totalorder %s1790_s29, %s1783_s24 }
  0x86   : > { %p1787_p4 = pneg %p1786_p2  ;;  %p1793_p11 = por %p1792_p3, %p1791_p1 }
  0x88   : > { %p1794_p10 = pnand %p1793_p11, %p1787_p4 }
  0x8a   : > { %1797 = shalt.err (!%p1794_p10)
}
  0x8b   : > { %p2435_p13 = scmp.ne.s32.totalorder %s2427_s8, 0  ;;  %s322_s1 = scalar_lea.vmem [#allocation10], %s2082_s13 }
  0x8c   : > { %s329_s10 = sshll.u32 %s322_s1, 4  ;;  %s1798_s23 = scalar_lea.hbm %s2170_s14, 64  ;;  %s330_s10 = int_to_ptr.vmem [resolvable:$true] %s329_s10 }
  0x8d   : > { %1565 = dma.hbm_to_vmem [thread:$0]  (!%p2435_p13), %s2161_s12, 64, %s2164_s3, %s282_s15  }
  0x8e   : > { %p1799_p6 = scmp.ne.s32.totalorder %s2170_s14, %s1798_s23  ;;  %s1803_s21 = scalar_lea.hbm %s2388_s2, 128 }
  0x8f   : > { %p1804_p0 = scmp.lt.u32.totalorder %s2170_s14, %s2388_s2  ;;  %p1805_p5 = scmp.lt.u32.totalorder %s1803_s21, %s1798_s23 }
  0x90   : > { %p1801_p8 = pnand %p1799_p6, %p2434_p7  ;;  %p1807_p2 = scmp.lt.u32.totalorder %s1798_s23, %s2170_s14 }
  0x91   : > { %p1806_p9 = por %p1805_p5, %p1804_p0 }
  0x92   : > { %p1802_p12 = pneg %p1801_p8 }
  0x93   : > { %p1808_p4 = por %p1807_p2, %p1806_p9 }
  0x95   : > { %p1809_p1 = pnand %p1808_p4, %p1802_p12 }
  0x97   : > { %1812 = shalt.err (!%p1809_p1)
}
  0x98   : > { %s1813_s13 = scalar_lea.vmem %s330_s10, 64  ;;  %s1928_s12 = smov [#allocation10]  }
  0x99   : > { %p1814_p3 = scmp.ne.s32.totalorder %s330_s10, %s1813_s13  ;;  %s1818_s3 = sshll.u32 %s1928_s12, 4  ;;  %s1819_s3 = int_to_ptr.vmem [resolvable:$false] %s1818_s3 }
  0x9a   : > { %s1820_s15 = scalar_lea.vmem %s1819_s3, 128  ;;  %p1821_p6 = scmp.lt.s32.totalorder %s330_s10, %s1819_s3 }
  0x9b   : > { %p1816_p11 = pnand %p1814_p3, %p2434_p7  ;;  %p1822_p8 = scmp.lt.s32.totalorder %s1820_s15, %s1813_s13 }
  0x9d   : > { %p1817_p10 = pneg %p1816_p11  ;;  %p1823_p13 = por %p1822_p8, %p1821_p6 }
  0x9f   : > { %p1824_p0 = pnand %p1823_p13, %p1817_p10 }
  0xa1   : > { %1827 = shalt.err (!%p1824_p0)
}
  0xa2   : > { %p2436_p5 = scmp.ne.s32.totalorder %s2427_s8, 0  ;;  %p2437_p12 = scmp.ne.s32.totalorder %s2420_s11, 0 }
  0xa3   : > { %s2217_s16 = sand.u32 (!%p2437_p12), 1, %s1902_s25   ;;  %p2438_p7 = scmp.ne.s32.totalorder (!%p2437_p12), %s2417_s9, 0 }
  0xa4   : > { %1571 = dma.hbm_to_vmem [thread:$0]  (!%p2436_p5), %s2170_s14, 64, %s330_s10, %s2106_s28  }
  0xa5   : > { %338 = sbr.rel (%p2437_p12) target bundleno = 1495 (0x5d7), region = 48  ;;  %s2220_s20 = sshll.u32 (!%p2437_p12), %s2217_s16, 2 }
  0xa6   : > { %s341_s29 = scalar_lea.sflag (!%p2437_p12), [#allocation6], %s2217_s16  ;;  %s344_s1 = scalar_lea.vmem (!%p2437_p12), [#allocation5], %s2220_s20 }
  0xac   : > { %1881 = dma.done.wait (%p2438_p7), %s341_s29, 64  }
  0xad   : > { %1883 = vsyncadd (%p2438_p7), %s341_s29, 4294967232  ;;  %s349_s28 = sand.u32 1, %s2009_s30   ;;  %s353_s8 = scalar_lea.vmem [#allocation8], %s2220_s20 }
  0xae   : > { %s350_s11 = scalar_lea.sflag [#allocation9], %s349_s28 }
  0xaf   : > { %1885 = dma.done.wait (%p2438_p7), %s350_s11, 128  }
  0xb0   : > { %1887 = vsyncadd (%p2438_p7), %s350_s11, 4294967168  ;;  %s362_s14 = scalar_lea.vmem [#allocation10], %s2220_s20  ;;  %p2439_p13 = scmp.eq.s32.totalorder %s2009_s30, 0 }
  0xb2   : > { %1889 = dma.done.wait (%p2439_p13), [#allocation12], 816   ;;  %p2440_p9 = pmov %p2439_p13 }
  0xb3   : > { %v1929_v0 = vmov 0.0   ;;  %vm1930_vm0 = vmmov 0   ;;  %v1644_v1 = vld [vmem:[#allocation11 + $0x10] sm:$0xff]   ;;  %v1645_v2 = vld [vmem:[#allocation11 + $0x18] sm:$0xff]   ;;  %vm442_vm1 = vcmask 261120   ;;  %v1646_v4 = vld [vmem:[#allocation11] sm:$0xff]  }
  0xb4   : > { %1891 = vsyncadd (%p2440_p9), [#allocation12], 4294966480  ;;  %1459 = vmatprep.subr.bf16.mxu0 %v1929_v0  ;;  %1463 = vmatprep.mubr.msk.bf16.mxu0 %vm1930_vm0, %v1929_v0  ;;  %v416_v3 = vld [vmem:[%s353_s8] sm:$0xf]  ;;  %v1647_v5 = vld [vmem:[#allocation11 + $0x8] sm:$0xff]   ;;  %vm556_vm2 = vcmask 257024  }
  0xb5   : > { %1467 = vmatprep.subr.bf16.mxu1 %v1929_v0  ;;  %1471 = vmatprep.mubr.msk.bf16.mxu1 %vm1930_vm0, %v1929_v0  ;;  %v560_v6 = vld [vmem:[%s344_s1] sm:$0xf]  ;;  %v1648_v7 = vld [vmem:[#allocation11 + $0x20] sm:$0xff]   ;;  %v486_v9 = vld [vmem:[%s362_s14] sm:$0xf]  ;;  %vm632_vm3 = vcmask 64512  }
  0xb6   : > { %1460 = vmatpush3.bf16.msra.mxu0 %v1644_v1  ;;  %1468 = vmatpush3.bf16.msra.mxu1 %v1648_v7  ;;  %v1649_v8 = vld [vmem:[#allocation11 + $0x28] sm:$0xff]   ;;  %v1391_v10 = vld [vmem:[#allocation13 + $0x1] ss:$0 sm:$0xff]  ;;  %v1399_v17 = vld [vmem:[#allocation13] ss:$0 sm:$0xff]  ;;  %s1931_s30 = smov 112  }
  0xb7   : > { %1461 = vmatprep.subr.bf16.mxu0 %v1929_v0  ;;  %1469 = vmatprep.subr.bf16.mxu1 %v1929_v0  ;;  %s1932_s9 = smov 120   ;;  %s1933_s10 = smov 104   ;;  %v1395_v30 = vld [vmem:[#allocation13 + $0x2] ss:$0 sm:$0xff]  ;;  %vm697_vm4 = vcmask 1043456   ;;  %vm745_vm5 = vcmask 60416  }
  0xb8   : > { %s1934_s23 = smov 8   ;;  %s1935_s22 = smov 16   ;;  %vm879_vm6 = vcmask 126016   ;;  %vm1012_vm7 = vcmask 191616   ;;  %vm1145_vm8 = vcmask 257216  }
  0xb9   : > { %s1936_s13 = smov 24   ;;  %s1390_s12 = sshll.u32 %s2217_s16, 3 }
  0xba   : > { %1462 = vmatpush3.bf16.msra.mxu0 %v1645_v2  ;;  %1470 = vmatpush3.bf16.msra.mxu1 %v1649_v8  ;;  %s1425_s20 = sshll.u32 %s1910_s27, 7  ;;  %s410_s29 = scalar_lea.vmem [#allocation14], %s1390_s12 }
  0xbb   : > { %1475 = vmatprep.subr.bf16.mxu0 %v1929_v0  ;;  %1483 = vmatprep.subr.bf16.mxu1 %v1929_v0  ;;  %s1230_s1 = sshll.u32 %s410_s29, 4  ;;  %s2336_s8 = scalar_lea.hbm %s2393_s7, %s1425_s20  ;;  %s2338_s1 = int_to_ptr.vmem [resolvable:$true] %s1230_s1 }
  0xbc   : > { %s1216_s27 = scalar_lea.sflag [#allocation7], %s2217_s16  ;;  %s1828_s14 = scalar_lea.vmem %s2338_s1, 128 }
  0xbd   : > { %1464 = vmatmul.mubr.msk.bf16.vlgmr.msra.gmra.mrb[0].mxu0 %vm442_vm1, %v416_v3  ;;  %1472 = vmatmul.mubr.msk.bf16.vlgmr.msra.gmra.mrb[0].mxu1 %vm442_vm1, %v486_v9  ;;  %p1829_p2 = scmp.ne.s32.totalorder %s2338_s1, %s1828_s14  ;;  %p2441_p4 = scmp.ne.s32.totalorder %s2425_s19, 0 }
  0xbe   : > { %1476 = vmatpush3.bf16.msra.mxu0 %v1646_v4  ;;  %1479 = vmatprep.mubr.msk.bf16.mxu0 %vm1930_vm0, %v1929_v0 }
  0xbf   : > { %1477 = vmatprep.subr.bf16.mxu0 %v1929_v0  ;;  %1485 = vmatprep.mubr.msk.bf16.mxu1 %vm1930_vm0, %v1929_v0  ;;  %p1830_p1 = pnand %p1829_p2, %p2441_p4 }
  0xc1   : > { %p1831_p3 = pneg %p1830_p1 }
  0xc2   : > { %1478 = vmatpush3.bf16.msra.mxu0 %v1647_v5 }
  0xc3   : > { %1489 = vmatprep.subr.bf16.mxu0 %v1929_v0 }
  0xc5   : > { %1480 = vmatmul.mubr.msk.bf16.vlgmr.msra.gmra.mrb[4].mxu0 %vm442_vm1, %v560_v6 }
  0xc6   : > { %1491 = vmatprep.mubr.msk.bf16.mxu0 %vm1930_vm0, %v1929_v0 }
 0x190   : > { %v480_v11 = vpop.f32.mrb[0].mxu0  ;;  %v549_v31 = vpop.f32.mrb[0].mxu1 }
 0x191   : > { %v481_v12 = vadd.f32 %v1391_v10, %v480_v11  ;;  %v1465_v13 = vpop.f32.mrb[1].mxu0  ;;  %v550_v32 = vadd.f32 %v1395_v30, %v549_v31  ;;  %v1473_v33 = vpop.f32.mrb[1].mxu1 }
 0x192   : > { %v483_v14 = vpop.f32.mrb[2].mxu0  ;;  %v552_v34 = vpop.f32.mrb[2].mxu1 }
 0x193   : > { %v555_v15 = vpack.c.bf16 %v481_v12, %v481_v12  ;;  %v1466_v16 = vpop.f32.mrb[3].mxu0  ;;  %v558_v35 = vpack.c.bf16 %v550_v32, %v550_v32  ;;  %v1474_v36 = vpop.f32.mrb[3].mxu1 }
 0x195   : > { %557 = vst.msk [vmem:[#allocation2] sm:$0xf] %vm556_vm2, %v555_v15  ;;  %559 = vst.msk [vmem:[#allocation3] sm:$0xf] %vm556_vm2, %v558_v35 }
 0x198   : > { %v622_v18 = vpop.f32.mrb[4].mxu0 }
 0x199   : > { %v623_v19 = vadd.f32 %v1399_v17, %v622_v18  ;;  %v1481_v20 = vpop.f32.mrb[5].mxu0 }
 0x19a   : > { %v625_v21 = vpop.f32.mrb[6].mxu0 }
 0x19b   : > { %v628_v22 = vmul.f32 0.35355338, %v623_v19  ;;  %v1482_v23 = vpop.f32.mrb[7].mxu0 }
 0x19c   : > { %v630_v24 = vld [vmem:[#allocation2] sm:$0xf]  ;;  %v631_v37 = vld [vmem:[#allocation3] sm:$0xf] }
 0x19d   : > { %v1650_v25 = vld [vmem:[#allocation2] ss:$0 sps:$4 sm:$0xff]   ;;  %v637_v26 = vsel %vm632_vm3, %v630_v24, 0  ;;  %v629_v28 = vpack.c.bf16 %v628_v22, %v628_v22  ;;  %v699_v38 = vsel %vm697_vm4, %v631_v37, 0  ;;  %v1653_v3 = vld [vmem:[#allocation3] ss:$0 sps:$4 sm:$0xff]  }
 0x19e   : > { %v1651_v27 = vld [vmem:[#allocation2] ss:$0 sps:$4 sm:$0xff]   ;;  %1484 = vmatpush3.bf16.xpose.msra.mxu1 %v637_v26  ;;  %888 = vrot.lane.b32.xlu1 %v1650_v25, %s1931_s30  ;;  %v1654_v6 = vld [vmem:[#allocation3] ss:$0 sps:$4 sm:$0xff]  }
 0x19f   : > { %755 = vrot.lane.b32.xlu0 %v1651_v27, %s1932_s9  ;;  %1495 = vmatprep.subr.bf16.mxu1 %v1929_v0  ;;  %v1652_v29 = vld [vmem:[#allocation2] ss:$0 sps:$4 sm:$0xff]   ;;  %v1655_v10 = vld [vmem:[#allocation3] ss:$0 sps:$4 sm:$0xff]  }
 0x1a0   : > { %1490 = vmatpush3.bf16.msra.mxu0 %v699_v38 }
 0x1a1   : > { %1501 = vmatprep.subr.bf16.mxu0 %v1929_v0 }
 0x1a2   : > { %883 = vrot.lane.b32.xlu1 %v629_v28, %s1931_s30 }
 0x1a3   : > { %750 = vrot.lane.b32.xlu0 %v629_v28, %s1932_s9 }
 0x1a5   : > { %1486 = vmatmul.mubr.msk.bf16.vlgmr.msra.gmra.mrb[4].mxu1 %vm632_vm3, %v629_v28 }
 0x1a6   : > { %1016 = vrot.lane.b32.xlu1 %v629_v28, %s1933_s10  ;;  %1497 = vmatprep.mubr.msk.bf16.mxu1 %vm1930_vm0, %v1929_v0 }
 0x1a7   : > { %1021 = vrot.lane.b32.xlu0 %v1652_v29, %s1933_s10 }
 0x210   : > { %v889_v41 = vpop.permute.xlu1 %888 }
 0x211   : > { %v756_v39 = vpop.permute.xlu0 %755  ;;  %v894_v43 = vsel %vm632_vm3, %v889_v41, 0 }
 0x212   : > { %v761_v40 = vsel %vm632_vm3, %v756_v39, 0 }
 0x213   : > { %1496 = vmatpush3.bf16.xpose.msra.mxu1 %v761_v40 }
 0x214   : > { %1507 = vmatprep.subr.bf16.mxu1 %v1929_v0  ;;  %v884_v45 = vpop.permute.xlu1 %883 }
 0x215   : > { %v751_v42 = vpop.permute.xlu0 %750 }
 0x218   : > { %v1017_v47 = vpop.permute.xlu1 %1016 }
 0x219   : > { %v1022_v44 = vpop.permute.xlu0 %1021 }
 0x21a   : > { %1498 = vmatmul.mubr.msk.bf16.vlgmr.msra.gmra.mrb[8].mxu1 %vm632_vm3, %v751_v42  ;;  %v1027_v46 = vsel %vm632_vm3, %v1022_v44, 0 }
 0x21b   : > { %1508 = vmatpush3.bf16.xpose.msra.mxu1 %v894_v43  ;;  %1509 = vmatprep.mubr.msk.bf16.mxu1 %vm1930_vm0, %v1929_v0 }
 0x21c   : > { %1519 = vmatprep.subr.bf16.mxu1 %v1929_v0 }
 0x222   : > { %1510 = vmatmul.mubr.msk.bf16.vlgmr.msra.gmra.mrb[12].mxu1 %vm632_vm3, %v884_v45 }
 0x223   : > { %1520 = vmatpush3.bf16.xpose.msra.mxu1 %v1027_v46  ;;  %1521 = vmatprep.mubr.msk.bf16.mxu1 %vm1930_vm0, %v1929_v0 }
 0x224   : > { %1531 = vmatprep.subr.bf16.mxu1 %v1929_v0 }
 0x22a   : > { %1522 = vmatmul.mubr.msk.bf16.vlgmr.msra.gmra.mrb[16].mxu1 %vm632_vm3, %v1017_v47 }
 0x22b   : > { %1535 = vmatprep.mubr.msk.bf16.mxu1 %vm1930_vm0, %v1929_v0 }
 0x278   : > { %v673_v48 = vpop.f32.mrb[4].mxu1 }
 0x279   : > { %v1487_v49 = vpop.f32.mrb[5].mxu1  ;;  %v679_v50 = vsel %vm632_vm3, %v673_v48, -inf }
 0x27a   : > { %680 = vmax.xlane.f32.xlu0 %v679_v50  ;;  %v676_v51 = vpop.f32.mrb[6].mxu1 }
 0x27b   : > { %v1488_v52 = vpop.f32.mrb[7].mxu1 }
 0x2ed   : > { %v797_v53 = vpop.f32.mrb[8].mxu1 }
 0x2ee   : > { %v1499_v54 = vpop.f32.mrb[9].mxu1  ;;  %v803_v55 = vsel %vm632_vm3, %v797_v53, -inf }
 0x2ef   : > { %804 = vmax.xlane.f32.xlu1 %v803_v55  ;;  %v800_v56 = vpop.f32.mrb[10].mxu1 }
 0x2f0   : > { %v1500_v57 = vpop.f32.mrb[11].mxu1 }
 0x2f5   : > { %v930_v58 = vpop.f32.mrb[12].mxu1 }
 0x2f6   : > { %v1511_v59 = vpop.f32.mrb[13].mxu1  ;;  %v936_v60 = vsel %vm632_vm3, %v930_v58, -inf }
 0x2f7   : > { %937 = vmax.xlane.f32.xlu0 %v936_v60  ;;  %v933_v61 = vpop.f32.mrb[14].mxu1 }
 0x2f8   : > { %v1512_v62 = vpop.f32.mrb[15].mxu1 }
 0x2fd   : > { %v1063_v63 = vpop.f32.mrb[16].mxu1 }
 0x2fe   : > { %v1523_v1 = vpop.f32.mrb[17].mxu1  ;;  %v1069_v2 = vsel %vm632_vm3, %v1063_v63, -inf }
 0x2ff   : > { %1070 = vmax.xlane.f32.xlu0 %v1069_v2  ;;  %v1066_v4 = vpop.f32.mrb[18].mxu1 }
 0x300   : > { %821 = vrot.lane.b32.xlu1 %v1653_v3, %s1932_s9  ;;  %v1524_v5 = vpop.f32.mrb[19].mxu1 }
 0x304   : > { %1087 = vrot.lane.b32.xlu1 %v1654_v6, %s1933_s10 }
 0x307   : > { %v681_v7 = vpop.xlane.xlu0 %680 }
 0x308   : > { %v685_v8 = vsub.f32 %v673_v48, %v681_v7  ;;  %v682_v42 = vsub.f32 -inf, %v681_v7 }
 0x30a   : > { %v686_v9 = vmul.f32 1.442695, %v685_v8  ;;  %v683_v43 = vmul.f32 1.442695, %v682_v42 }
 0x30c   : > { %1658 = vpow2.f32 %v686_v9 }
 0x315   : > { %954 = vrot.lane.b32.xlu0 %v1655_v10, %s1931_s30  ;;  %s1937_s30 = smov [#allocation14]  }
 0x316   : > { %v1659_v11 = vpop.eup %1658  ;;  %s1832_s9 = sshll.u32 %s1937_s30, 4  ;;  %s1833_s9 = int_to_ptr.vmem [resolvable:$false] %s1832_s9 }
 0x317   : > { %v693_v12 = vpack.c.bf16 %v1659_v11, %v1659_v11  ;;  %v689_v29 = vsel %vm632_vm3, %v1659_v11, 0.0  ;;  %s1834_s10 = scalar_lea.vmem %s1833_s9, 256  ;;  %p1835_p11 = scmp.lt.s32.totalorder %s2338_s1, %s1833_s9 }
 0x318   : > { %p1836_p10 = scmp.lt.s32.totalorder %s1834_s10, %s1828_s14 }
 0x319   : > { %1492 = vmatmul.mubr.msk.bf16.vlgmr.msra.gmra.mrb[8].mxu0 %vm632_vm3, %v693_v12 }
 0x31a   : > { %1503 = vmatprep.mubr.msk.bf16.mxu0 %vm1930_vm0, %v1929_v0  ;;  %p1837_p6 = por %p1836_p10, %p1835_p11 }
 0x31c   : > { %p1838_p8 = pnand %p1837_p6, %p1831_p3 }
 0x37c   : > { %v805_v13 = vpop.xlane.xlu1 %804 }
 0x37d   : > { %v809_v14 = vsub.f32 %v797_v53, %v805_v13  ;;  %v806_v53 = vsub.f32 -inf, %v805_v13 }
 0x37f   : > { %v810_v15 = vmul.f32 1.442695, %v809_v14  ;;  %v807_v54 = vmul.f32 1.442695, %v806_v53 }
 0x380   : > { %v822_v16 = vpop.permute.xlu1 %821 }
 0x381   : > { %v827_v17 = vsel %vm697_vm4, %v822_v16, 0  ;;  %1660 = vpow2.f32 %v810_v15 }
 0x382   : > { %1502 = vmatpush3.bf16.msra.mxu0 %v827_v17 }
 0x383   : > { %1513 = vmatprep.subr.bf16.mxu0 %v1929_v0 }
 0x384   : > { %v938_v18 = vpop.xlane.xlu0 %937  ;;  %v1088_v31 = vpop.permute.xlu1 %1087 }
 0x385   : > { %v942_v19 = vsub.f32 %v930_v58, %v938_v18  ;;  %v1093_v34 = vsel %vm697_vm4, %v1088_v31, 0  ;;  %v939_v55 = vsub.f32 -inf, %v938_v18 }
 0x387   : > { %v943_v20 = vmul.f32 1.442695, %v942_v19  ;;  %v940_v56 = vmul.f32 1.442695, %v939_v55 }
 0x389   : > { %1662 = vpow2.f32 %v943_v20  ;;  %v1656_v20 = vld [vmem:[%s2391_s5] sm:$0xff]  }
 0x38a   : > { %1532 = vmatpush3.bf16.msra.mxu1 %v1656_v20 }
 0x38b   : > { %v1661_v21 = vpop.eup %1660  ;;  %1533 = vmatprep.subr.bf16.mxu1 %v1929_v0 }
 0x38c   : > { %v1071_v22 = vpop.xlane.xlu0 %1070  ;;  %v813_v24 = vsel %vm632_vm3, %v1661_v21, 0.0  ;;  %v817_v25 = vpack.c.bf16 %v1661_v21, %v1661_v21 }
 0x38d   : > { %v1075_v23 = vsub.f32 %v1063_v63, %v1071_v22  ;;  %814 = vadd.xlane.f32.xlu1 %v813_v24  ;;  %v1072_v57 = vsub.f32 -inf, %v1071_v22 }
 0x38e   : > { %1504 = vmatmul.mubr.msk.bf16.vlgmr.msra.gmra.mrb[12].mxu0 %vm632_vm3, %v817_v25 }
 0x38f   : > { %v1076_v26 = vmul.f32 1.442695, %v1075_v23  ;;  %1515 = vmatprep.mubr.msk.bf16.mxu0 %vm1930_vm0, %v1929_v0  ;;  %v1073_v59 = vmul.f32 1.442695, %v1072_v57  ;;  %v1657_v23 = vld [vmem:[%s2391_s5 + $0x8] sm:$0xff]  }
 0x390   : > { %v955_v27 = vpop.permute.xlu0 %954  ;;  %1534 = vmatpush3.bf16.msra.mxu1 %v1657_v23 }
 0x391   : > { %v960_v28 = vsel %vm697_vm4, %v955_v27, 0  ;;  %1664 = vpow2.f32 %v1076_v26  ;;  %690 = vadd.xlane.f32.xlu1 %v689_v29 }
 0x392   : > { %1514 = vmatpush3.bf16.msra.mxu0 %v960_v28  ;;  %1666 = vpow2.f32 %v683_v43 }
 0x393   : > { %1525 = vmatprep.subr.bf16.mxu0 %v1929_v0  ;;  %v1663_v30 = vpop.eup %1662 }
 0x394   : > { %v946_v32 = vsel %vm632_vm3, %v1663_v30, 0.0  ;;  %v950_v33 = vpack.c.bf16 %v1663_v30, %v1663_v30 }
 0x395   : > { %947 = vadd.xlane.f32.xlu0 %v946_v32 }
 0x396   : > { %1516 = vmatmul.mubr.msk.bf16.vlgmr.msra.gmra.mrb[16].mxu0 %vm632_vm3, %v950_v33 }
 0x397   : > { %1526 = vmatpush3.bf16.msra.mxu0 %v1093_v34  ;;  %1527 = vmatprep.mubr.msk.bf16.mxu0 %vm1930_vm0, %v1929_v0 }
 0x39b   : > { %v1665_v35 = vpop.eup %1664 }
 0x39c   : > { %v1079_v36 = vsel %vm632_vm3, %v1665_v35, 0.0  ;;  %v1083_v37 = vpack.c.bf16 %v1665_v35, %v1665_v35  ;;  %v1667_v44 = vpop.eup %1666 }
 0x39d   : > { %1080 = vadd.xlane.f32.xlu0 %v1079_v36  ;;  %v688_v46 = vmul.f32 0.0, %v1667_v44  ;;  %v1420_v36 = vld [vmem:[%s2392_s6] ss:$0 sm:$0xff] }
 0x39e   : > { %1528 = vmatmul.mubr.msk.bf16.vlgmr.msra.gmra.mrb[20].mxu0 %vm632_vm3, %v1083_v37 }
 0x3ec   : > { %v735_v38 = vpop.f32.mrb[8].mxu0 }
 0x3ed   : > { %v1493_v39 = vpop.f32.mrb[9].mxu0  ;;  %v741_v49 = vadd.f32 %v735_v38, %v688_v46 }
 0x3ee   : > { %v738_v40 = vpop.f32.mrb[10].mxu0 }
 0x3ef   : > { %v1494_v41 = vpop.f32.mrb[11].mxu0 }
 0x41a   : > { %v815_v45 = vpop.xlane.xlu1 %814 }
 0x41e   : > { %v691_v47 = vpop.xlane.xlu1 %690 }
 0x41f   : > { %v692_v48 = vadd.f32 %v691_v47, %v688_v46 }
 0x421   : > { %1668 = vrcp.f32 %v692_v48 }
 0x422   : > { %1670 = vpow2.f32 %v807_v54  ;;  %v948_v63 = vpop.xlane.xlu0 %947 }
 0x423   : > { %1672 = vpow2.f32 %v940_v56 }
 0x424   : > { %1674 = vpow2.f32 %v1073_v59 }
 0x42a   : > { %v1081_v5 = vpop.xlane.xlu0 %1080 }
 0x42b   : > { %v1669_v50 = vpop.eup %1668 }
 0x42c   : > { %v743_v51 = vmul.f32 %v1669_v50, %v741_v49  ;;  %v1671_v58 = vpop.eup %1670 }
 0x42d   : > { %v812_v60 = vmul.f32 0.0, %v1671_v58  ;;  %v1673_v62 = vpop.eup %1672 }
 0x42e   : > { %v744_v52 = vpack.c.bf16 %v743_v51, %v743_v51  ;;  %v945_v1 = vmul.f32 0.0, %v1673_v62  ;;  %v1675_v3 = vpop.eup %1674 }
 0x42f   : > { %v816_v61 = vadd.f32 %v815_v45, %v812_v60  ;;  %v1078_v9 = vmul.f32 0.0, %v1675_v3 }
 0x430   : > { %746 = vst.msk [vmem:[#allocation4] sm:$0xf] %vm745_vm5, %v744_v52  ;;  %v949_v2 = vadd.f32 %v948_v63, %v945_v1 }
 0x431   : > { %1676 = vrcp.f32 %v816_v61  ;;  %v1082_v13 = vadd.f32 %v1081_v5, %v1078_v9 }
 0x432   : > { %1678 = vrcp.f32 %v949_v2 }
 0x433   : > { %1680 = vrcp.f32 %v1082_v13 }
 0x43b   : > { %v1677_v8 = vpop.eup %1676 }
 0x43c   : > { %v1679_v18 = vpop.eup %1678 }
 0x43d   : > { %v1681_v28 = vpop.eup %1680 }
 0x461   : > { %v863_v4 = vpop.f32.mrb[12].mxu0 }
 0x462   : > { %v869_v6 = vadd.f32 %v863_v4, %v812_v60  ;;  %v1505_v7 = vpop.f32.mrb[13].mxu0 }
 0x463   : > { %v866_v10 = vpop.f32.mrb[14].mxu0 }
 0x464   : > { %v871_v11 = vmul.f32 %v1677_v8, %v869_v6  ;;  %v1506_v12 = vpop.f32.mrb[15].mxu0 }
 0x466   : > { %v1428_v14 = vpack.c.bf16 %v871_v11, %v871_v11 }
 0x468   : > { %876 = vrot.lane.b32.xlu0 %v1428_v14, %s1934_s23 }
 0x469   : > { %v996_v15 = vpop.f32.mrb[16].mxu0 }
 0x46a   : > { %v1002_v16 = vadd.f32 %v996_v15, %v945_v1  ;;  %v1517_v17 = vpop.f32.mrb[17].mxu0 }
 0x46b   : > { %v999_v19 = vpop.f32.mrb[18].mxu0 }
 0x46c   : > { %v1004_v21 = vmul.f32 %v1679_v18, %v1002_v16  ;;  %v1518_v22 = vpop.f32.mrb[19].mxu0 }
 0x46e   : > { %v1429_v24 = vpack.c.bf16 %v1004_v21, %v1004_v21 }
 0x470   : > { %1009 = vrot.lane.b32.xlu1 %v1429_v24, %s1935_s22 }
 0x471   : > { %v1129_v25 = vpop.f32.mrb[20].mxu0 }
 0x472   : > { %v1135_v26 = vadd.f32 %v1129_v25, %v1078_v9  ;;  %v1529_v27 = vpop.f32.mrb[21].mxu0 }
 0x473   : > { %v1132_v29 = vpop.f32.mrb[22].mxu0 }
 0x474   : > { %v1137_v30 = vmul.f32 %v1681_v28, %v1135_v26  ;;  %v1530_v31 = vpop.f32.mrb[23].mxu0 }
 0x476   : > { %v1430_v32 = vpack.c.bf16 %v1137_v30, %v1137_v30 }
 0x478   : > { %1142 = vrot.lane.b32.xlu1 %v1430_v32, %s1936_s13 }
 0x4da   : > { %v877_v33 = vpop.permute.xlu0 %876 }
 0x4db   : > { %880 = vst.msk [vmem:[#allocation4] sm:$0xf] %vm879_vm6, %v877_v33 }
 0x4e2   : > { %v1010_v0 = vpop.permute.xlu1 %1009 }
 0x4e3   : > { %1013 = vst.msk [vmem:[#allocation4] sm:$0xf] %vm1012_vm7, %v1010_v0 }
 0x4ea   : > { %v1143_v34 = vpop.permute.xlu1 %1142 }
 0x4eb   : > { %1146 = vst.msk [vmem:[#allocation4] sm:$0xf] %vm1145_vm8, %v1143_v34 }
 0x4f2   : > { %v1147_v35 = vld [vmem:[#allocation4] sm:$0xf] }
 0x4f3   : > { %1536 = vmatmul.mubr.msk.bf16.vlgmr.msra.gmra.mrb[20].mxu1 %vm442_vm1, %v1147_v35 }
 0x5c6   : > { %v1208_v37 = vpop.f32.mrb[20].mxu1 }
 0x5c7   : > { %v1209_v38 = vadd.f32 %v1420_v36, %v1208_v37  ;;  %v1537_v39 = vpop.f32.mrb[21].mxu1 }
 0x5c8   : > { %v1211_v40 = vpop.f32.mrb[22].mxu1 }
 0x5c9   : > { %v1538_v41 = vpop.f32.mrb[23].mxu1  ;;  %1214 = vst.msk [vmem:[%s410_s29] sm:$0xff] %vm442_vm1, %v1209_v38 }
 0x5ca   : > { %1841 = shalt.err (!%p1838_p8)
}
 0x5cb   : > { %s1842_s16 = scalar_lea.hbm %s2336_s8, 128  ;;  %s1846_s17 = scalar_lea.hbm %s2393_s7, 256 }
 0x5cc   : > { %p1843_p0 = scmp.ne.s32.totalorder %s2336_s8, %s1842_s16  ;;  %p1847_p7 = scmp.lt.u32.totalorder %s2336_s8, %s2393_s7 }
 0x5cd   : > { %p1848_p13 = scmp.lt.u32.totalorder %s1846_s17, %s1842_s16  ;;  %p1850_p2 = scmp.lt.u32.totalorder %s1842_s16, %s2336_s8 }
 0x5ce   : > { %p1844_p5 = pnand %p1843_p0, %p2441_p4 }
 0x5cf   : > { %p1849_p9 = por %p1848_p13, %p1847_p7 }
 0x5d0   : > { %p1845_p12 = pneg %p1844_p5 }
 0x5d1   : > { %p1851_p1 = por %p1850_p2, %p1849_p9 }
 0x5d3   : > { %p1852_p3 = pnand %p1851_p1, %p1845_p12 }
 0x5d5   : > { %1855 = shalt.err (!%p1852_p3)
}
 0x5d6   : > { %1553 = dma.vmem_to_hbm [thread:$0]  (%p2441_p4), %s2338_s1, 128, %s2336_s8, %s1216_s27  }
 0x5d7 PF: > { %s2442_s22 = sld [smem:[#allocation19_spill]]  ;;  %s2443_s13 = sld [smem:[#allocation22_spill]] }
 0x5d8   : > { %s2444_s12 = sld [smem:[#allocation21_spill]] }
 0x5dd   : > { %s1242_s3 = sand.u32 1, %s2442_s22   ;;  %p2445_p11 = scmp.ne.s32.totalorder %s2443_s13, 0 }
 0x5de   : > { %p2446_p10 = scmp.ge.s32.totalorder %s2444_s12, 2  ;;  %s1243_s15 = scalar_lea.sflag [#allocation7], %s1242_s3 }
 0x5e0   : > { %p1573_p6 = pnand %p2446_p10, %p2445_p11 }
 0x5e2   : > { %1893 = dma.done.wait (!%p1573_p6), %s1243_s15, 128  }
 0x5e3   : > { %1895 = vsyncadd (!%p1573_p6), %s1243_s15, 4294967168  ;;  %s27_s29 = sadd.s32 1, %s2444_s12   ;;  %s2447_s19 = sld [smem:[#allocation24_spill]] }
 0x5e4   : > { %p24_p8 = scmp.ge.s32.totalorder %s27_s29, 4   ;;  %s2448_s27 = sld [smem:[#allocation20_spill]] }
 0x5e5   : > { %s2449_s28 = sld [smem:[#allocation23_spill]]  ;;  %s2450_s24 = smov %s1902_s25 }
 0x5e6   : > { %s2451_s25 = smov %s1906_s26  ;;  %26 = sbr.rel (!%p24_p8) target bundleno = 12 (0xc), region = 133 }
 0x5e9   : > { %s2452_s26 = smov %s2447_s19 }
 0x5ed   :  { %1248 = vsyncpa [#allocation6], 1 }
 0x5ee   :  { %1250 = vsyncpa [#allocation6 + $0x1], 1 }
 0x5ef   :  { %1251 = vsyncpa [#allocation9], 1 }
 0x5f0   :  { %1253 = vsyncpa [#allocation9 + $0x1], 1 }
 0x5f1   :  { %1254 = vsyncpa [#allocation12], 1 }
 0x5f2   :  { %1255 = vsyncpa [#allocation7], 1 }
 0x5f3   :  { %1257 = vsyncpa [#allocation7 + $0x1], 1 }

</bundles_post_ra>
